<compile_context>
chip_gen: v7x
topology: tpu7x:2x2x1
jax: 0.10.0
libtpu: 0.0.40
codegen_flags: <defaults>
</compile_context>

<pallas_src>
import jax
import jax.numpy as jnp
from jax.experimental import pallas as pl
from jax.experimental.pallas import tpu as pltpu

N_ACTIONS = 50
N_STATES = 20
HIDDEN = 100

LANE = 128      # TPU lane width
SUBLANE = 8     # f32 sublane width
H_PAD = 128     # HIDDEN padded to lane width
A_PAD = 128     # N_ACTIONS padded to lane width


def _round_up(n, m):
    return ((n + m - 1) // m) * m


def net_kernel(x_ref, w1_ref, b1_ref, w2_ref, b2_ref, o_ref):
    # fc1: (tB, S) @ (S, 128) + (1, 128)  -- lane-dense because HIDDEN is padded
    h = jnp.dot(x_ref[...], w1_ref[...], preferred_element_type=jnp.float32)
    h = jnp.maximum(h + b1_ref[...], 0.0)              # ReLU on the VPU
    # out: (tB, 128) @ (128, 128) + (1, 128) -- padded hidden/action lanes are zero
    y = jnp.dot(h, w2_ref[...], preferred_element_type=jnp.float32)
    y = y + b2_ref[...]
    o_ref[...] = y.astype(o_ref.dtype)


def _pad_params(w1, b1, w2, b2):
    """Zero-pad params to lane-dense (…,128) layout.  Zero fill ⇒ padded lanes stay 0."""
    w1p = jnp.zeros((N_STATES, H_PAD), jnp.float32).at[:, :HIDDEN].set(w1)
    b1p = jnp.zeros((1, H_PAD), jnp.float32).at[:, :HIDDEN].set(b1.reshape(1, HIDDEN))
    w2p = jnp.zeros((H_PAD, A_PAD), jnp.float32).at[:HIDDEN, :N_ACTIONS].set(w2)
    b2p = jnp.zeros((1, A_PAD), jnp.float32).at[:, :N_ACTIONS].set(b2.reshape(1, N_ACTIONS))
    return w1p, b1p, w2p, b2p


def _forward_small(x, w1p, b1p, w2p, b2p):
    """Tiny-batch path: no grid, no pipeline machinery — everything lives in VMEM."""
    B = x.shape[0]
    Bp = _round_up(B, SUBLANE)
    xp = x if Bp == B else jnp.zeros((Bp, N_STATES), x.dtype).at[:B].set(x)
    vmem = pl.BlockSpec(memory_space=pltpu.MemorySpace.VMEM)
    out = pl.pallas_call(
        net_kernel,
        out_shape=jax.ShapeDtypeStruct((Bp, A_PAD), jnp.float32),
        in_specs=[vmem, vmem, vmem, vmem, vmem],
        out_specs=vmem,
    )(xp, w1p, b1p, w2p, b2p)
    return out[:B, :N_ACTIONS]


def _forward_batched(x, w1p, b1p, w2p, b2p, tile_b):
    """Large-batch path: tile the batch; weights/biases stay resident across the grid."""
    B = x.shape[0]
    Bp = _round_up(B, tile_b)
    xp = x if Bp == B else jnp.zeros((Bp, N_STATES), x.dtype).at[:B].set(x)
    grid = (pl.cdiv(Bp, tile_b),)
    out = pl.pallas_call(
        net_kernel,
        out_shape=jax.ShapeDtypeStruct((Bp, A_PAD), jnp.float32),
        grid_spec=pltpu.PrefetchScalarGridSpec(
            num_scalar_prefetch=0,
            grid=grid,
            in_specs=[
                pl.BlockSpec((tile_b, N_STATES), lambda i: (i, 0)),
                pl.BlockSpec((N_STATES, H_PAD), lambda i: (0, 0)),
                pl.BlockSpec((1, H_PAD), lambda i: (0, 0)),
                pl.BlockSpec((H_PAD, A_PAD), lambda i: (0, 0)),
                pl.BlockSpec((1, A_PAD), lambda i: (0, 0)),
            ],
            out_specs=pl.BlockSpec((tile_b, A_PAD), lambda i: (i, 0)),
        ),
        # Batch tiles are independent: "parallel" lets v7x split them across 2 TCs.
        compiler_params=pltpu.CompilerParams(
            dimension_semantics=("parallel",),
        ),
    )(xp, w1p, b1p, w2p, b2p)
    return out[:B, :N_ACTIONS]


def net_forward(x, w1, b1, w2, b2, tile_b=512):
    """Forward pass of `Net`.  x: (B, N_STATES) f32.  Returns (B, N_ACTIONS) f32."""
    # TODO(synk): optionally cast x/w1/w2 to bfloat16 (keeping f32 accumulation)
    # to halve DMA bytes at very large B; kept f32 here to match PyTorch numerics.
    w1p, b1p, w2p, b2p = _pad_params(w1, b1, w2, b2)
    B = x.shape[0]
    if B <= tile_b:
        return _forward_small(x, w1p, b1p, w2p, b2p)
    return _forward_batched(x, w1p, b1p, w2p, b2p, tile_b)


def init_params(key):
    k1, k2, k3 = jax.random.split(key, 3)
    # fc1.weight ~ N(0, 0.1), stored as (in, out) = (N_STATES, HIDDEN)
    w1 = 0.1 * jax.random.normal(k1, (N_STATES, HIDDEN), dtype=jnp.float32)
    # fc1.bias: PyTorch default uniform(-1/sqrt(fan_in), 1/sqrt(fan_in))
    bound1 = 1.0 / jnp.sqrt(jnp.float32(N_STATES))
    b1 = jax.random.uniform(
        k2, (1, HIDDEN), dtype=jnp.float32, minval=-bound1, maxval=bound1
    )
    # out.weight ~ N(0, 0.1), stored as (in, out) = (HIDDEN, N_ACTIONS)
    w2 = 0.1 * jax.random.normal(k3, (HIDDEN, N_ACTIONS), dtype=jnp.float32)
    # out.bias filled with 0.5 (as in the PyTorch module)
    b2 = jnp.full((1, N_ACTIONS), 0.5, dtype=jnp.float32)
    return w1, b1, w2, b2


def _reference(x, w1, b1, w2, b2):
    return jnp.maximum(x @ w1 + b1, 0.0) @ w2 + b2


if __name__ == "__main__":
    key = jax.random.PRNGKey(0)
    pkey, xkey, xkey2 = jax.random.split(key, 3)
    w1, b1, w2, b2 = init_params(pkey)

    # --- small-batch path (single-agent DQN stepping) ---
    B = 8
    x = jax.random.normal(xkey, (B, N_STATES), dtype=jnp.float32)
    out = jax.block_until_ready(net_forward(x, w1, b1, w2, b2))
    ref = _reference(x, w1, b1, w2, b2)
    assert out.shape == (B, N_ACTIONS)
    assert jnp.allclose(out, ref, atol=1e-4, rtol=1e-4)

    # --- batched path (replay-buffer sized batch, non-divisible by the tile) ---
    Bb = 600
    xb = jax.random.normal(xkey2, (Bb, N_STATES), dtype=jnp.float32)
    outb = jax.block_until_ready(net_forward(xb, w1, b1, w2, b2, tile_b=256))
    refb = _reference(xb, w1, b1, w2, b2)
    assert outb.shape == (Bb, N_ACTIONS)
    assert jnp.allclose(outb, refb, atol=1e-4, rtol=1e-4)

    print("KERNEL_OK")
</pallas_src>

<mosaic_0001>
module attributes {stable_mosaic.version = 11 : i64} {
  func.func @net_kernel(%arg0: memref<8x20xf32, #tpu.memory_space<vmem>>, %arg1: memref<20x128xf32, #tpu.memory_space<vmem>>, %arg2: memref<1x128xf32, #tpu.memory_space<vmem>>, %arg3: memref<128x128xf32, #tpu.memory_space<vmem>>, %arg4: memref<1x128xf32, #tpu.memory_space<vmem>>, %arg5: memref<8x128xf32, #tpu.memory_space<vmem>>) attributes {dimension_semantics = [], scalar_prefetch = 0 : i64, scratch_operands = 0 : i64, tpu.core_type = #tpu.core_type<tc>} {
    %c0 = arith.constant 0 : index
    %c0_0 = arith.constant 0 : index
    %0 = vector.load %arg0[%c0, %c0_0] : memref<8x20xf32, #tpu.memory_space<vmem>>, vector<8x20xf32>
    %c0_1 = arith.constant 0 : index
    %c0_2 = arith.constant 0 : index
    %1 = vector.load %arg1[%c0_1, %c0_2] : memref<20x128xf32, #tpu.memory_space<vmem>>, vector<20x128xf32>
    %cst = arith.constant dense<0.000000e+00> : vector<8x128xf32>
    %2 = tpu.matmul %0, %1, %cst {dimension_numbers = #tpu.dot_dimension_numbers<[1], [0], [0], [1], [0, 0, 1, 1], [], []>} : vector<8x20xf32>, vector<20x128xf32>, vector<8x128xf32> -> vector<8x128xf32>
    %c0_3 = arith.constant 0 : index
    %c0_4 = arith.constant 0 : index
    %3 = vector.load %arg2[%c0_3, %c0_4] : memref<1x128xf32, #tpu.memory_space<vmem>>, vector<1x128xf32>
    %4 = vector.broadcast %3 : vector<1x128xf32> to vector<8x128xf32>
    %5 = arith.addf %2, %4 : vector<8x128xf32>
    %cst_5 = arith.constant 0.000000e+00 : f32
    %6 = vector.broadcast %cst_5 : f32 to vector<8x128xf32>
    %7 = arith.maximumf %5, %6 : vector<8x128xf32>
    %c0_6 = arith.constant 0 : index
    %c0_7 = arith.constant 0 : index
    %8 = vector.load %arg3[%c0_6, %c0_7] : memref<128x128xf32, #tpu.memory_space<vmem>>, vector<128x128xf32>
    %cst_8 = arith.constant dense<0.000000e+00> : vector<8x128xf32>
    %9 = tpu.matmul %7, %8, %cst_8 {dimension_numbers = #tpu.dot_dimension_numbers<[1], [0], [0], [1], [0, 0, 1, 1], [], []>} : vector<8x128xf32>, vector<128x128xf32>, vector<8x128xf32> -> vector<8x128xf32>
    %c0_9 = arith.constant 0 : index
    %c0_10 = arith.constant 0 : index
    %10 = vector.load %arg4[%c0_9, %c0_10] : memref<1x128xf32, #tpu.memory_space<vmem>>, vector<1x128xf32>
    %11 = vector.broadcast %10 : vector<1x128xf32> to vector<8x128xf32>
    %12 = arith.addf %9, %11 : vector<8x128xf32>
    %c0_11 = arith.constant 0 : index
    %c0_12 = arith.constant 0 : index
    %13 = vector.load %arg5[%c0_11, %c0_12] : memref<8x128xf32, #tpu.memory_space<vmem>>, vector<8x128xf32>
    tpu.vector_store %arg5[%c0_11, %c0_12], %12 {strides = array<i32>} : memref<8x128xf32, #tpu.memory_space<vmem>>, vector<8x128xf32>,
    return
  }
}

</mosaic_0001>

<bundles_post_ra>
// kernel: tpu_custom_call.1
= control target key start
LH: loop header
LB: loop body
LE: loop exit
PB: predicated region body
PF: predicated region fallthrough
CT: control target
= control target key end

     0   :  { %10 = vsyncpa [#allocation3], 0  ;;  %s558_s0 = inlined_call_operand.hbm [shape: f32[8,20], index: 0, kind: input, shape index: {}]   ;;  %s559_s1 = inlined_call_operand.hbm [shape: f32[20,128], index: 1, kind: input, shape index: {}]   ;;  %s560_s2 = inlined_call_operand.vmem [shape: f32[1,128], index: 2, kind: input, shape index: {}]   ;;  %s561_s3 = inlined_call_operand.hbm [shape: f32[128,128], index: 3, kind: input, shape index: {}]   ;;  %s562_s4 = inlined_call_operand.vmem [shape: f32[1,128], index: 4, kind: input, shape index: {}]   ;;  %s563_s5 = inlined_call_operand.hbm [shape: f32[8,128], index: 5, kind: output, shape index: {}]  }
   0x1   :  { %11 = vsyncpa [#allocation6], 0 }
   0x2   :  { %12 = vsyncpa [#allocation4], 0  ;;  %s459_s18 = smov [#allocation5]   ;;  %s365_s22 = scalar_lea.hbm %s559_s1, 384 }
   0x3   :  { %s28_s19 = sshll.u32 %s459_s18, 4  ;;  %p366_p0 = scmp.ne.s32.totalorder %s559_s1, %s365_s22  ;;  %s29_s19 = int_to_ptr.vmem [resolvable:$true] %s28_s19 }
   0x4   :  { %p369_p1 = scmp.lt.u32.totalorder %s365_s22, %s559_s1 }
   0x6   :  { %p371_p2 = pnand %p369_p1, %p366_p0 }
   0x8   :  { %374 = shalt.err (!%p371_p2)
}
   0x9   :  { %s375_s27 = scalar_lea.vmem %s29_s19, 384  ;;  %p380_p4 = scmp.lt.s32.totalorder %s29_s19, %s29_s19 }
   0xa   :  { %p376_p3 = scmp.ne.s32.totalorder %s29_s19, %s375_s27  ;;  %p381_p5 = scmp.lt.s32.totalorder %s375_s27, %s375_s27 }
   0xc   :  { %p382_p6 = por %p381_p5, %p380_p4 }
   0xe   :  { %p383_p7 = pnand %p382_p6, %p376_p3 }
  0x10   :  { %386 = shalt.err (!%p383_p7)
}
  0x11   :  { %s460_s28 = smov 128   ;;  %s461_s29 = smov 8  }
  0x12   :  { %34 = dma.hbm_to_vmem [thread:$0]  %s559_s1, 384, %s29_s19, [#allocation6], %s460_s28, %s460_s28, %s461_s29  }
  0x13   :  { %s462_s7 = smov [#allocation2]   ;;  %s463_s9 = smov [#allocation7]  }
  0x14   :  { %s19_s8 = sshll.u32 %s462_s7, 4  ;;  %s42_s10 = sshll.u32 %s463_s9, 4  ;;  %s20_s8 = int_to_ptr.vmem [resolvable:$true] %s19_s8  ;;  %s43_s10 = int_to_ptr.vmem [resolvable:$true] %s42_s10 }
  0x15   :  { %s387_s13 = scalar_lea.hbm %s558_s0, 128 }
  0x16   :  { %p388_p8 = scmp.ne.s32.totalorder %s558_s0, %s387_s13  ;;  %p391_p9 = scmp.lt.u32.totalorder %s387_s13, %s558_s0 }
  0x18   :  { %p393_p10 = pnand %p391_p9, %p388_p8 }
  0x1a   :  { %396 = shalt.err (!%p393_p10)
}
  0x1b   :  { %s397_s1 = scalar_lea.vmem %s20_s8, 128  ;;  %p402_p12 = scmp.lt.s32.totalorder %s20_s8, %s20_s8 }
  0x1c   :  { %p398_p11 = scmp.ne.s32.totalorder %s20_s8, %s397_s1  ;;  %p403_p13 = scmp.lt.s32.totalorder %s397_s1, %s397_s1 }
  0x1e   :  { %p404_p0 = por %p403_p13, %p402_p12 }
  0x20   :  { %p405_p1 = pnand %p404_p0, %p398_p11 }
  0x22   :  { %408 = shalt.err (!%p405_p1)
}
  0x23   :  { %22 = dma.hbm_to_vmem [thread:$0]  %s558_s0, 128, %s20_s8, [#allocation3]  }
  0x24   :  { %s409_s22 = scalar_lea.hbm %s561_s3, 2048 }
  0x25   :  { %p410_p2 = scmp.ne.s32.totalorder %s561_s3, %s409_s22  ;;  %p413_p3 = scmp.lt.u32.totalorder %s409_s22, %s561_s3 }
  0x27   :  { %p415_p4 = pnand %p413_p3, %p410_p2 }
  0x29   :  { %418 = shalt.err (!%p415_p4)
}
  0x2a   :  { %s419_s27 = scalar_lea.vmem %s43_s10, 2048  ;;  %p424_p6 = scmp.lt.s32.totalorder %s43_s10, %s43_s10 }
  0x2b   :  { %p420_p5 = scmp.ne.s32.totalorder %s43_s10, %s419_s27  ;;  %p425_p7 = scmp.lt.s32.totalorder %s419_s27, %s419_s27 }
  0x2d   :  { %p426_p8 = por %p425_p7, %p424_p6 }
  0x2f   :  { %p427_p9 = pnand %p426_p8, %p420_p5 }
  0x31   :  { %430 = shalt.err (!%p427_p9)
}
  0x32   :  { %48 = dma.hbm_to_vmem [thread:$0]  %s561_s3, 2048, %s43_s10, [#allocation6], %s460_s28, %s460_s28, %s461_s29  }
  0x33   :  { %453 = dma.done.wait [#allocation3], 128  }
  0x34   :  { %454 = vsyncadd [#allocation3], 4294967168 }
  0x35   :  { %455 = dma.done.wait [#allocation6], 2432  }
  0x36   :  { %456 = vsyncadd [#allocation6], 4294964864  ;;  %v464_v0 = vmov 0.0|0.0   ;;  %vm465_vm0 = vmmov 0   ;;  %v466_v1 = vmov 0.0   ;;  %v61_v2 = vld [vmem:[#allocation5] sm:$0xff] }
  0x37   :  { %329 = vmatprep.subr.bf16.mxu0 %v464_v0  ;;  %291 = vmatprep.mubr.msk.f32.mxu0 %vm465_vm0, %v466_v1  ;;  %v62_v3 = vld [vmem:[#allocation5 + $0x8] sm:$0xff]  ;;  %v150_v5 = vld [vmem:[#allocation7] sm:$0xff]  ;;  %v151_v6 = vld [vmem:[#allocation7 + $0x8] sm:$0xff]  ;;  %vm75_vm1 = vcmask 1043456   ;;  %vm71_vm2 = vcmask 162816   ;;  %s467_s7 = smov [#allocation8]  }
  0x38   :  { %332 = vmatprep.subr.bf16.mxu1 %v464_v0  ;;  %326 = vmatprep.mubr.msk.f32.mxu1 %vm465_vm0, %v466_v1  ;;  %v330_v4 = vpack.c.bf16 %v62_v3, %v61_v2  ;;  %v333_v7 = vpack.c.bf16 %v151_v6, %v150_v5  ;;  %v152_v8 = vld [vmem:[#allocation7 + $0x10] sm:$0xff]  ;;  %v153_v9 = vld [vmem:[#allocation7 + $0x18] sm:$0xff]  ;;  %v60_v12 = vld [vmem:[#allocation2] sm:$0xff]  ;;  %s250_s8 = sshll.u32 %s467_s7, 4  ;;  %s251_s8 = int_to_ptr.vmem [resolvable:$true] %s250_s8 }
  0x39   :  { %v63_v10 = vld [vmem:[#allocation5 + $0x10] sm:$0xf]  ;;  %v336_v11 = vpack.c.bf16 %v153_v9, %v152_v8  ;;  %v154_v13 = vld [vmem:[#allocation7 + $0x20] sm:$0xff]  ;;  %v155_v14 = vld [vmem:[#allocation7 + $0x28] sm:$0xff]  ;;  %s431_s9 = scalar_lea.vmem %s251_s8, 128  ;;  %p436_p11 = scmp.lt.s32.totalorder %s251_s8, %s251_s8 }
  0x3a   :  { %331 = vmatpush3.bf16.msra.mxu0 %v330_v4  ;;  %334 = vmatpush3.bf16.msra.mxu1 %v333_v7  ;;  %v339_v15 = vpack.c.bf16 %v155_v14, %v154_v13  ;;  %v156_v16 = vld [vmem:[#allocation7 + $0x30] sm:$0xff]  ;;  %v157_v17 = vld [vmem:[#allocation7 + $0x38] sm:$0xff]  ;;  %v158_v19 = vld [vmem:[#allocation7 + $0x40] sm:$0xff]  ;;  %p432_p10 = scmp.ne.s32.totalorder %s251_s8, %s431_s9  ;;  %p437_p12 = scmp.lt.s32.totalorder %s431_s9, %s431_s9 }
  0x3b   :  { %289 = vmatprep.subr.mxu0 %v466_v1  ;;  %335 = vmatprep.subr.bf16.mxu1 %v464_v0  ;;  %v342_v18 = vpack.c.bf16 %v157_v17, %v156_v16  ;;  %v159_v20 = vld [vmem:[#allocation7 + $0x48] sm:$0xff]  ;;  %v160_v22 = vld [vmem:[#allocation7 + $0x50] sm:$0xff]  ;;  %v161_v23 = vld [vmem:[#allocation7 + $0x58] sm:$0xff] }
  0x3c   :  { %v345_v21 = vpack.c.bf16 %v159_v20, %v158_v19  ;;  %v348_v24 = vpack.c.bf16 %v161_v23, %v160_v22  ;;  %v162_v25 = vld [vmem:[#allocation7 + $0x60] sm:$0xff]  ;;  %v163_v26 = vld [vmem:[#allocation7 + $0x68] sm:$0xff]  ;;  %v164_v28 = vld [vmem:[#allocation7 + $0x70] sm:$0xff]  ;;  %p438_p13 = por %p437_p12, %p436_p11 }
  0x3d   :  { %v351_v27 = vpack.c.bf16 %v163_v26, %v162_v25  ;;  %v165_v29 = vld [vmem:[#allocation7 + $0x78] sm:$0xff]  ;;  %v260_v31 = vld [vmem:[%s560_s2] ss:$0 sm:$0xff] }
  0x3e   :  { %290 = vmatpush3.msk.msra.mxu0 %vm75_vm1, %v63_v10  ;;  %337 = vmatpush3.bf16.msra.mxu1 %v336_v11  ;;  %v354_v30 = vpack.c.bf16 %v165_v29, %v164_v28  ;;  %v263_v36 = vld [vmem:[%s562_s4] ss:$0 sm:$0xff]  ;;  %p439_p0 = pnand %p438_p13, %p432_p10 }
  0x3f   :  { %292 = vmatmul.mubr.msk.f32.vlgmr.msra.gmra.mrb[0].mxu0 %vm71_vm2, %v60_v12  ;;  %338 = vmatprep.subr.bf16.mxu1 %v464_v0 }
  0x42   :  { %340 = vmatpush3.bf16.msra.mxu1 %v339_v15 }
  0x43   :  { %341 = vmatprep.subr.bf16.mxu1 %v464_v0 }
  0x46   :  { %343 = vmatpush3.bf16.msra.mxu1 %v342_v18 }
  0x47   :  { %344 = vmatprep.subr.bf16.mxu1 %v464_v0 }
  0x4a   :  { %346 = vmatpush3.bf16.msra.mxu1 %v345_v21 }
  0x4b   :  { %347 = vmatprep.subr.bf16.mxu1 %v464_v0 }
  0x4e   :  { %349 = vmatpush3.bf16.msra.mxu1 %v348_v24 }
  0x4f   :  { %350 = vmatprep.subr.bf16.mxu1 %v464_v0 }
  0x52   :  { %352 = vmatpush3.bf16.msra.mxu1 %v351_v27 }
  0x53   :  { %353 = vmatprep.subr.bf16.mxu1 %v464_v0 }
  0x56   :  { %355 = vmatpush3.bf16.msra.mxu1 %v354_v30 }
 0x112   :  { %v145_v32 = vpop.f32.mrb[0].mxu0 }
 0x113   :  { %v146_v33 = vadd.f32 %v260_v31, %v145_v32  ;;  %v293_v34 = vpop.f32.mrb[1].mxu0 }
 0x115   :  { %v149_v35 = vmax.f32 %v146_v33, 0.0 }
 0x117   :  { %327 = vmatmul.mubr.f32.vlgmr.msra.gmra.mrb[0].mxu1 %v149_v35 }
 0x1ea   :  { %v239_v37 = vpop.f32.mrb[0].mxu1 }
 0x1eb   :  { %v240_v38 = vadd.f32 %v263_v36, %v239_v37  ;;  %v328_v39 = vpop.f32.mrb[1].mxu1 }
 0x1ed   :  { %243 = vst [vmem:[#allocation8] sm:$0xff] %v240_v38 }
 0x1ee   :  { %442 = shalt.err (!%p439_p0)
}
 0x1ef   :  { %s443_s11 = scalar_lea.hbm %s563_s5, 128 }
 0x1f0   :  { %p444_p1 = scmp.ne.s32.totalorder %s563_s5, %s443_s11  ;;  %p447_p2 = scmp.lt.u32.totalorder %s443_s11, %s563_s5 }
 0x1f2   :  { %p449_p3 = pnand %p447_p2, %p444_p1 }
 0x1f4   :  { %452 = shalt.err (!%p449_p3)
}
 0x1f5   :  { %253 = dma.vmem_to_hbm [thread:$0]  %s251_s8, 128, %s563_s5, [#allocation4]  }
 0x1f6   :  { %457 = dma.done.wait [#allocation4], 128  }
 0x1f7   :  { %458 = vsyncadd [#allocation4], 4294967168 }
 0x1f8   :  { %257 = vsyncpa [#allocation3], 1 }
 0x1f9   :  { %258 = vsyncpa [#allocation6], 1 }
 0x1fa   :  { %259 = vsyncpa [#allocation4], 1 }

</bundles_post_ra>
